<compile_context>
chip_gen: v7x
topology: tpu7x:2x2x1
jax: 0.10.0
libtpu: 0.0.40
codegen_flags: <defaults>
</compile_context>

<pallas_src>
from functools import partial

import jax
import jax.numpy as jnp
from jax.experimental import pallas as pl
from jax.experimental.pallas import tpu as pltpu


def _patch_embed_kernel(p_ref, w_ref, pb_ref, o_ref):
    # p_ref  : (1, TN, K_pad)   bf16 flattened patches (one batch, one N-tile)
    # w_ref  : (K_pad, E_pad)   bf16 conv weight, reshaped + transposed, resident
    # pb_ref : (TN, E_pad)      bf16 (conv bias + positions[1:]) slab for this N-tile
    #                           (resident across the inner batch axis)
    # o_ref  : (1, TN, E_pad)   out_dtype output tile
    acc = jnp.dot(p_ref[0], w_ref[...], preferred_element_type=jnp.float32)
    o_ref[0] = (acc + pb_ref[...].astype(jnp.float32)).astype(o_ref.dtype)


def _pick_tile(n):
    """Largest candidate row-tile (multiple of 8, <=512) that divides n."""
    for cand in (512, 256, 128, 64, 32, 16, 8):
        if n % cand == 0:
            return cand
    return None


@partial(jax.jit, static_argnames=("patch_size", "out_dtype"))
def patch_embedding(x, conv_w, conv_b, cls_token, positions, patch_size,
                    out_dtype=jnp.bfloat16):
    """
    x         : (B, C, H, W)  NCHW, float32
    conv_w    : (E, C, P, P)  PyTorch Conv2d weight layout
    conv_b    : (E,)
    cls_token : (1, 1, E)
    positions : (N+1, E)
    returns   : (B, N+1, E) out_dtype
    """
    B, C, H, W = x.shape
    E = conv_w.shape[0]
    P = patch_size
    Hp, Wp = H // P, W // P
    N = Hp * Wp
    K = C * P * P

    # --- glue: cast to bf16 BEFORE the im2col shuffle (halves its bytes), ----
    # --- extract non-overlapping patches, flatten in (C, P, P) order ---------
    xb = x.astype(jnp.bfloat16)
    patches = xb.reshape(B, C, Hp, P, Wp, P)
    patches = patches.transpose(0, 2, 4, 1, 3, 5)          # (B, Hp, Wp, C, P, P)
    patches = patches.reshape(B, N, K)

    # --- pad K and E to multiples of 128 (lane-dense, clean MXU passes) ------
    K_pad = ((K + 127) // 128) * 128
    E_pad = ((E + 127) // 128) * 128

    # --- tile along N; pad N when it has no multiple-of-8 tile divisor -------
    TN = _pick_tile(N)
    N_pad = N
    if TN is None:
        if N < 8:
            TN = N                         # full-extent block is always legal
        else:
            align = 256 if N >= 128 else 8  # 256-aligned tiles for the 2x256^2 MXU
            N_pad = ((N + align - 1) // align) * align
            TN = _pick_tile(N_pad)

    # conv weight (E, C, P, P) -> (K_pad, E_pad) bf16 so patches @ w == conv out
    w = conv_w.reshape(E, K).T.astype(jnp.bfloat16)                   # (K, E)
    # bias + positions pre-folded in f32, stored as one bf16 slab (single round)
    bias_plus_pos = (conv_b[None, :] + positions[1:, :]).astype(jnp.bfloat16)

    if K_pad != K:
        patches = jnp.pad(patches, ((0, 0), (0, 0), (0, K_pad - K)))
        w = jnp.pad(w, ((0, K_pad - K), (0, 0)))
    if E_pad != E:
        w = jnp.pad(w, ((0, 0), (0, E_pad - E)))
        bias_plus_pos = jnp.pad(bias_plus_pos, ((0, 0), (0, E_pad - E)))
    if N_pad != N:
        patches = jnp.pad(patches, ((0, 0), (0, N_pad - N), (0, 0)))
        bias_plus_pos = jnp.pad(bias_plus_pos, ((0, N_pad - N), (0, 0)))

    # --- explicit VMEM budget: weight counted ONCE (resident), rest x2 -------
    out_itemsize = jnp.dtype(out_dtype).itemsize
    need = (
        2 * TN * K_pad * 2                 # patches block (bf16), double-buffered
        + K_pad * E_pad * 2                # weight (bf16), resident
        + 2 * TN * E_pad * 2               # bias+pos slab (bf16), double-buffered
        + 2 * TN * E_pad * out_itemsize    # output block, double-buffered
    )
    # 4 MiB headroom for compiler scratch; 32 MiB cap keeps v7x (64 MiB/TC) safe.
    vmem_limit = int(min(max(need + (4 << 20), 16 << 20), 32 << 20))

    out_pad = pl.pallas_call(
        _patch_embed_kernel,
        out_shape=jax.ShapeDtypeStruct((B, N_pad, E_pad), out_dtype),
        grid_spec=pltpu.PrefetchScalarGridSpec(
            num_scalar_prefetch=0,
            # Batch innermost: the bias/pos slab block index (j) is constant
            # across the inner loop, so it is only re-DMA'd when the N-tile
            # changes -> its HBM traffic drops by a factor of B.
            grid=(N_pad // TN, B),
            in_specs=[
                pl.BlockSpec((1, TN, K_pad), lambda j, b: (b, j, 0)),
                pl.BlockSpec((K_pad, E_pad), lambda j, b: (0, 0)),   # resident
                pl.BlockSpec((TN, E_pad), lambda j, b: (j, 0)),      # per N-tile
            ],
            out_specs=pl.BlockSpec((1, TN, E_pad), lambda j, b: (b, j, 0)),
        ),
        compiler_params=pltpu.CompilerParams(
            dimension_semantics=("parallel", "parallel"),
            vmem_limit_bytes=vmem_limit),
    )(patches, w, bias_plus_pos)

    out_tokens = out_pad[:, :N, :E]                          # (B, N, E)

    # cls row computed exactly in f32, cast once, prepended outside the kernel.
    cls_row = (cls_token.reshape(1, E) + positions[0:1, :]).astype(out_dtype)
    cls_rows = jnp.broadcast_to(cls_row[None, :, :], (B, 1, E))
    return jnp.concatenate([cls_rows, out_tokens], axis=1)   # (B, N+1, E)


if __name__ == "__main__":
    # Small shapes consistent with the module:
    # batch=2, in_channels=4, img_size=16, patch_size=8, d_model=32
    B, C, IMG, P, E = 2, 4, 16, 8, 32
    N = (IMG // P) ** 2  # 4 patches -> seq len 5 with cls token

    key = jax.random.PRNGKey(0)
    kx, kw, kb, kc, kp = jax.random.split(key, 5)

    x = jax.random.normal(kx, (B, C, IMG, IMG), dtype=jnp.float32)
    conv_w = jax.random.normal(kw, (E, C, P, P), dtype=jnp.float32) * 0.02
    conv_b = jax.random.normal(kb, (E,), dtype=jnp.float32) * 0.02
    cls_token = jax.random.normal(kc, (1, 1, E), dtype=jnp.float32)
    positions = jax.random.normal(kp, (N + 1, E), dtype=jnp.float32)

    out = patch_embedding(x, conv_w, conv_b, cls_token, positions,
                          patch_size=P, out_dtype=jnp.bfloat16)
    out = jax.block_until_ready(out)

    # reference check in plain JAX (f32 conv via lax.conv_general_dilated);
    # tolerance loosened because the kernel uses bf16 operands / bf16 output.
    ref_conv = jax.lax.conv_general_dilated(
        x, conv_w, window_strides=(P, P), padding="VALID",
        dimension_numbers=("NCHW", "OIHW", "NCHW"))  # (B, E, Hp, Wp)
    ref_conv = ref_conv + conv_b[None, :, None, None]
    ref_tok = ref_conv.reshape(B, E, N).transpose(0, 2, 1)       # (B, N, E)
    ref = jnp.concatenate(
        [jnp.broadcast_to(cls_token, (B, 1, E)), ref_tok], axis=1) + positions

    assert out.shape == (B, N + 1, E)
    assert jnp.allclose(out.astype(jnp.float32), ref, atol=3e-2, rtol=3e-2)
    print("KERNEL_OK")
</pallas_src>

<mosaic_0001>
module attributes {stable_mosaic.version = 11 : i64} {
  func.func @_patch_embed_kernel(%arg0: i32, %arg1: i32, %arg2: memref<1x4x256xbf16, #tpu.memory_space<vmem>>, %arg3: memref<256x128xbf16, #tpu.memory_space<vmem>>, %arg4: memref<4x128xbf16, #tpu.memory_space<vmem>>, %arg5: memref<1x4x128xbf16, #tpu.memory_space<vmem>>) attributes {dimension_semantics = [#tpu.dimension_semantics<parallel>, #tpu.dimension_semantics<parallel>], iteration_bounds = array<i64: 1, 2>, scalar_prefetch = 0 : i64, scratch_operands = 0 : i64, tpu.core_type = #tpu.core_type<tc>, window_params = [{transform_indices = @transform_0, window_bounds = array<i64: 1, 4, 256>}, {pipeline_mode = #tpu.pipeline_mode<synchronous>, transform_indices = @transform_1, window_bounds = array<i64: 256, 128>}, {transform_indices = @transform_2, window_bounds = array<i64: 4, 128>}, {transform_indices = @transform_3, window_bounds = array<i64: 1, 4, 128>}]} {
    %c0 = arith.constant 0 : index
    %c0_0 = arith.constant 0 : index
    %c0_1 = arith.constant 0 : index
    %0 = vector.load %arg2[%c0, %c0_0, %c0_1] : memref<1x4x256xbf16, #tpu.memory_space<vmem>>, vector<1x4x256xbf16>
    %1 = vector.shape_cast %0 : vector<1x4x256xbf16> to vector<4x256xbf16>
    %c0_2 = arith.constant 0 : index
    %c0_3 = arith.constant 0 : index
    %2 = vector.load %arg3[%c0_2, %c0_3] : memref<256x128xbf16, #tpu.memory_space<vmem>>, vector<256x128xbf16>
    %cst = arith.constant dense<0.000000e+00> : vector<4x128xf32>
    %3 = tpu.matmul %1, %2, %cst {dimension_numbers = #tpu.dot_dimension_numbers<[1], [0], [0], [1], [0, 0, 1, 1], [], []>} : vector<4x256xbf16>, vector<256x128xbf16>, vector<4x128xf32> -> vector<4x128xf32>
    %c0_4 = arith.constant 0 : index
    %c0_5 = arith.constant 0 : index
    %4 = vector.load %arg4[%c0_4, %c0_5] : memref<4x128xbf16, #tpu.memory_space<vmem>>, vector<4x128xbf16>
    %5 = arith.extf %4 : vector<4x128xbf16> to vector<4x128xf32>
    %6 = arith.addf %3, %5 : vector<4x128xf32>
    %7 = arith.truncf %6 : vector<4x128xf32> to vector<4x128xbf16>
    %c0_6 = arith.constant 0 : index
    %c0_7 = arith.constant 0 : index
    %c0_8 = arith.constant 0 : index
    %8 = vector.load %arg5[%c0_6, %c0_7, %c0_8] : memref<1x4x128xbf16, #tpu.memory_space<vmem>>, vector<1x4x128xbf16>
    %9 = vector.shape_cast %8 : vector<1x4x128xbf16> to vector<4x128xbf16>
    %10 = vector.shape_cast %7 : vector<4x128xbf16> to vector<1x4x128xbf16>
    tpu.vector_store %arg5[%c0_6, %c0_7, %c0_8], %10 {strides = array<i32>} : memref<1x4x128xbf16, #tpu.memory_space<vmem>>, vector<1x4x128xbf16>,
    return
  }
  func.func @transform_0(%arg0: i32, %arg1: i32) -> (i32, i32, i32) {
    %c0_i32 = arith.constant 0 : i32
    %c0_i32_0 = arith.constant 0 : i32
    return %arg1, %arg0, %c0_i32 : i32, i32, i32
  }
  func.func @transform_1(%arg0: i32, %arg1: i32) -> (i32, i32) {
    %c0_i32 = arith.constant 0 : i32
    %c0_i32_0 = arith.constant 0 : i32
    %c0_i32_1 = arith.constant 0 : i32
    return %c0_i32, %c0_i32_0 : i32, i32
  }
  func.func @transform_2(%arg0: i32, %arg1: i32) -> (i32, i32) {
    %c0_i32 = arith.constant 0 : i32
    %c0_i32_0 = arith.constant 0 : i32
    return %arg0, %c0_i32 : i32, i32
  }
  func.func @transform_3(%arg0: i32, %arg1: i32) -> (i32, i32, i32) {
    %c0_i32 = arith.constant 0 : i32
    %c0_i32_0 = arith.constant 0 : i32
    return %arg1, %arg0, %c0_i32 : i32, i32, i32
  }
}

</mosaic_0001>

<bundles_post_ra>
// kernel: patch_embedding.1
= control target key start
LH: loop header
LB: loop body
LE: loop exit
PB: predicated region body
PF: predicated region fallthrough
CT: control target
= control target key end

     0   :  { %s636_s12 = smov 0   ;;  %s638_s13 = smov 0   ;;  %s724_s0 = inlined_call_operand.vmem [shape: bf16[2,4,256], index: 0, kind: input, shape index: {}]   ;;  %s725_s1 = inlined_call_operand.vmem [shape: bf16[256,128], index: 1, kind: input, shape index: {}]   ;;  %s726_s2 = inlined_call_operand.vmem [shape: bf16[4,128], index: 2, kind: input, shape index: {}]   ;;  %s727_s3 = inlined_call_operand.vmem [shape: bf16[2,4,128], index: 3, kind: output, shape index: {}]  }
   0x1   :  { %s640_s14 = smov 0  }
   0x2 LB: > { %s22_s15 = sadd.s32 1, %s610_s13  ;;  %p506_p0 = scmp.ge.s32.totalorder %s614_s14, 1  ;;  %s614_s14 = sphi %s640_s14, %s13_s14   ;;  %s610_s13 = sphi %s638_s13, %s729_s13   ;;  %s606_s12 = sphi %s636_s12, %s728_s12  }
   0x3   : > { %p23_p1 = scmp.ge.s32.totalorder %s22_s15, 2  ;;  %p166_p2 = scmp.lt.s32.totalorder %s614_s14, 3 }
   0x5   : > { %s731_s15 = smov (%p23_p1, %s22_s15), 0  ;;  %p167_p3 = pnand %p506_p0, %p166_p2 }
   0x6   : > { %v576_v0 = vld [vmem:[%s725_s1 + $0x40] sm:$0xff] (!%p167_p3)   ;;  %v578_v2 = vld [vmem:[%s725_s1 + $0x48] sm:$0xff] (!%p167_p3)   ;;  %p200_p4 = scmp.lt.s32.totalorder (!%p167_p3), %s606_s12, 1  ;;  %v580_v4 = vld [vmem:[%s725_s1 + $0x50] sm:$0xff] (!%p167_p3)  }
   0x7   : > { %170 = sbr.rel (%p167_p3) target bundleno = 259 (0x103), region = 32  ;;  %v577_v1 = vld [vmem:[%s725_s1] sm:$0xff] (!%p167_p3)   ;;  %530 = vmatprep.subr.bf16.mxu0 (!%p167_p3), %v576_v0  ;;  %v579_v3 = vld [vmem:[%s725_s1 + $0x8] sm:$0xff] (!%p167_p3)   ;;  %v581_v5 = vld [vmem:[%s725_s1 + $0x10] sm:$0xff] (!%p167_p3)  }
   0x8   : > { %531 = vmatpush3.bf16.msra.mxu0 (!%p167_p3), %v577_v1  ;;  %v582_v6 = vld [vmem:[%s725_s1 + $0x58] sm:$0xff] (!%p167_p3)   ;;  %v584_v8 = vld [vmem:[%s725_s1 + $0x60] sm:$0xff] (!%p167_p3)   ;;  %v586_v10 = vld [vmem:[%s725_s1 + $0x68] sm:$0xff] (!%p167_p3)  }
   0x9   : > { %532 = vmatprep.subr.bf16.mxu0 (!%p167_p3), %v578_v2  ;;  %v583_v7 = vld [vmem:[%s725_s1 + $0x18] sm:$0xff] (!%p167_p3)   ;;  %v585_v9 = vld [vmem:[%s725_s1 + $0x20] sm:$0xff] (!%p167_p3)   ;;  %v587_v13 = vld [vmem:[%s725_s1 + $0x28] sm:$0xff] (!%p167_p3)  }
   0xa   : > { %v588_v14 = vld [vmem:[%s725_s1 + $0x70] sm:$0xff] (!%p167_p3)   ;;  %v590_v16 = vld [vmem:[%s725_s1 + $0x78] sm:$0xff] (!%p167_p3)   ;;  %v254_v18 = vld [vmem:[%s726_s2] sm:$0x3] (!%p167_p3) }
   0xb   : > { %v589_v15 = vld [vmem:[%s725_s1 + $0x30] sm:$0xff] (!%p167_p3)   ;;  %v591_v17 = vld [vmem:[%s725_s1 + $0x38] sm:$0xff] (!%p167_p3)   ;;  %v255_v20 = vunpack.c.l.bf16 (!%p167_p3), %v254_v18 }
   0xc   : > { %533 = vmatpush3.bf16.msra.mxu0 (!%p167_p3), %v579_v3 }
   0xd   : > { %534 = vmatprep.subr.bf16.mxu0 (!%p167_p3), %v580_v4 }
   0xe   : > { %s733_s12 = smov (!%p200_p4, %s606_s12), 1 }
   0xf   : > { %s529_s30 = sshll.u32 %s733_s12, 2  ;;  %s509_s4 = sshll.u32 %s733_s12, 1 }
  0x10   : > { %535 = vmatpush3.bf16.msra.mxu0 %v581_v5  ;;  %s208_s10 = scalar_lea.vmem %s724_s0, %s529_s30  ;;  %s219_s7 = scalar_lea.vmem %s727_s3, %s509_s4 }
  0x11   : > { %536 = vmatprep.subr.bf16.mxu0 %v582_v6  ;;  %v510_v11 = vld.sshfl [vmem:[%s208_s10] sm:$0x33 pattern:$0x76325410] }
  0x12   : > { %v264_v12 = vcombine.high %v510_v11, %v510_v11 }
  0x14   : > { %537 = vmatpush3.bf16.msra.mxu0 %v583_v7  ;;  %395 = vmatprep.mubr.bf16.mxu0 %v264_v12 }
  0x15   : > { %538 = vmatprep.subr.bf16.mxu0 %v584_v8 }
  0x18   : > { %539 = vmatpush3.bf16.msra.mxu0 %v585_v9 }
  0x19   : > { %540 = vmatprep.subr.bf16.mxu0 %v586_v10 }
  0x1c   : > { %541 = vmatpush3.bf16.msra.mxu0 %v587_v13 }
  0x1d   : > { %542 = vmatprep.subr.bf16.mxu0 %v588_v14 }
  0x20   : > { %543 = vmatpush3.bf16.msra.mxu0 %v589_v15 }
  0x21   : > { %544 = vmatprep.subr.bf16.mxu0 %v590_v16 }
  0x24   : > { %545 = vmatpush3.bf16.msra.mxu0 %v591_v17 }
  0x27   : > { %396 = vmatmul.mubr.bf16.vlgmr.msra.gmra.mrb[0].mxu0 %v510_v11 }
  0xfa   : > { %v546_v19 = vpop.f32.mrb[0].mxu0 }
  0xfb   : > { %v547_v21 = vpop.f32.mrb[1].mxu0 }
  0xfc   : > { %v548_v22 = vadd.f32 %v547_v21, %v546_v19  ;;  %v549_v23 = vpop.f32.mrb[2].mxu0 }
  0xfd   : > { %v550_v24 = vpop.f32.mrb[3].mxu0 }
  0xfe   : > { %v398_v25 = vadd.f32 %v548_v22, %v255_v20 }
 0x100   : > { %v403_v26 = vpack.c.bf16 %v398_v25, %v398_v25 }
 0x102   : > { %404 = vst [vmem:[%s219_s7] sm:$0x3] %v403_v26 }
 0x103 PF: > { %s13_s14 = sadd.s32 1, %s614_s14   ;;  %s728_s12 = smov %s610_s13 }
 0x104   : > { %p10_p5 = scmp.ge.s32.totalorder %s13_s14, 4   ;;  %s729_s13 = smov %s731_s15 }
 0x106   :  { %12 = sbr.rel (!%p10_p5) target bundleno = 2 (0x2), region = 65 }

</bundles_post_ra>
